<compile_context>
chip_gen: v5e
topology: v5e:2x2
jax: 0.10.0
libtpu: 0.0.40
codegen_flags: <defaults>
</compile_context>

<pallas_src>
import math
import functools

import jax
import jax.numpy as jnp
import numpy as np
from jax.experimental import pallas as pl
from jax.experimental.pallas import tpu as pltpu


# ---------------------------------------------------------------------------
# Kernels
# ---------------------------------------------------------------------------
def _pe_add_kernel(x_ref, pe_ref, o_ref):
    # x_ref: (TS, B, D), pe_ref: (TS, 1, D) -> broadcast add over batch.
    o_ref[...] = (x_ref[...] + pe_ref[...]).astype(o_ref.dtype)


def _pe_add_dropout_kernel(x_ref, pe_ref, bits_ref, o_ref, *, threshold, scale):
    # x_ref/bits_ref: (TS, B, D), pe_ref: (TS, 1, D).
    # Inverted dropout: drop with prob p (bits < threshold), survivors * 1/(1-p).
    y = x_ref[...].astype(jnp.float32) + pe_ref[...].astype(jnp.float32)
    keep = (bits_ref[...] >= jnp.uint32(threshold)).astype(jnp.float32)
    o_ref[...] = (y * (keep * jnp.float32(scale))).astype(o_ref.dtype)


# ---------------------------------------------------------------------------
# Parameter construction (deterministic, mirrors the PyTorch __init__)
# ---------------------------------------------------------------------------
def make_pe(d_model, max_len=100, dtype=jnp.float32):
    position = jnp.arange(max_len, dtype=jnp.float32)[:, None]            # (L, 1)
    div_term = jnp.exp(
        jnp.arange(0, d_model, 2, dtype=jnp.float32) * (-math.log(10000.0) / d_model)
    )                                                                      # (D/2,)
    pe = jnp.zeros((max_len, d_model), dtype=jnp.float32)
    pe = pe.at[:, 0::2].set(jnp.sin(position * div_term))
    pe = pe.at[:, 1::2].set(jnp.cos(position * div_term))
    # unsqueeze(0).transpose(0, 1) -> (max_len, 1, d_model)
    return pe[:, None, :].astype(dtype)


# ---------------------------------------------------------------------------
# Wrapper
# ---------------------------------------------------------------------------
def _pick_seq_tile(S, B, D, itemsize, target_bytes=2 * 1024 * 1024):
    # ~2 MiB per x tile: big enough to hit the HBM roofline, small enough that
    # (x + bits + out) * double-buffering stays under v5e's 16 MiB scoped VMEM
    # default and well under v7x's 64 MiB physical VMEM.
    per_row = max(1, B * D * itemsize)
    return int(max(1, min(S, target_bytes // per_row)))


def positional_encoding_forward(x, pe, *, p=0.1, training=False, rng_key=None):
    """x: (S, B, D); pe: (max_len, 1, D). Returns (S, B, D)."""
    S, B, D = x.shape
    assert S <= pe.shape[0], "sequence longer than positional-encoding table"
    pe = pe.astype(x.dtype)  # avoid in-kernel dtype promotion; halves pe DMA for bf16

    TS = _pick_seq_tile(S, B, D, x.dtype.itemsize)
    grid = (pl.cdiv(S, TS),)
    x_spec = pl.BlockSpec((TS, B, D), lambda i: (i, 0, 0))
    pe_spec = pl.BlockSpec((TS, 1, D), lambda i: (i, 0, 0))
    bits_spec = pl.BlockSpec((TS, B, D), lambda i: (i, 0, 0))
    out_spec = pl.BlockSpec((TS, B, D), lambda i: (i, 0, 0))
    cparams = pltpu.CompilerParams(dimension_semantics=("parallel",))

    if (not training) or p == 0.0:
        # eval mode: dropout is identity, just the broadcast add
        return pl.pallas_call(
            _pe_add_kernel,
            out_shape=jax.ShapeDtypeStruct((S, B, D), x.dtype),
            grid_spec=pl.GridSpec(grid=grid, in_specs=[x_spec, pe_spec],
                                  out_specs=out_spec),
            compiler_params=cparams,
        )(x, pe)

    if rng_key is None:
        rng_key = jax.random.PRNGKey(0)
    # TODO(synk): in-kernel pltpu.prng_seed/prng_random_bits are not used because
    # the harness lowers this kernel through the CPU interpreter, where prng_seed
    # has no lowering rule; random bits are generated with jax.random outside and
    # consumed (threshold compare + scale) inside the kernel.
    bits = jax.random.bits(rng_key, x.shape, dtype=jnp.uint32)
    threshold = int(p * (2.0 ** 32))      # P(bits < threshold) == p  => dropped
    scale = 1.0 / (1.0 - p)

    kernel = functools.partial(_pe_add_dropout_kernel,
                               threshold=threshold, scale=scale)
    return pl.pallas_call(
        kernel,
        out_shape=jax.ShapeDtypeStruct((S, B, D), x.dtype),
        grid_spec=pl.GridSpec(grid=grid, in_specs=[x_spec, pe_spec, bits_spec],
                              out_specs=out_spec),
        compiler_params=cparams,
    )(x, pe, bits)


# ---------------------------------------------------------------------------
# Demo / self-check
# ---------------------------------------------------------------------------
if __name__ == "__main__":
    S, B, D = 8, 2, 32
    max_len = 100
    p = 0.1

    key = jax.random.PRNGKey(0)
    kx, kdrop = jax.random.split(key)
    x = jax.random.normal(kx, (S, B, D), dtype=jnp.float32)
    pe = make_pe(D, max_len=max_len)

    # --- eval mode (dropout == identity): verify exact semantics ---
    out_eval = jax.block_until_ready(
        positional_encoding_forward(x, pe, p=p, training=False))
    ref = x + pe[:S]  # broadcast (S,1,D) over batch
    np.testing.assert_allclose(np.asarray(out_eval), np.asarray(ref),
                               rtol=1e-6, atol=1e-6)

    # --- training mode: dropout mask + 1/(1-p) scaling applied in-kernel ---
    out_train = jax.block_until_ready(
        positional_encoding_forward(x, pe, p=p, training=True, rng_key=kdrop))
    out_train_np = np.asarray(out_train)
    ref_np = np.asarray(ref)
    assert out_train_np.shape == (S, B, D)
    # every surviving element must equal (x + pe) / (1 - p)
    kept = out_train_np != 0.0
    np.testing.assert_allclose(out_train_np[kept], ref_np[kept] / (1.0 - p),
                               rtol=1e-5, atol=1e-5)

    print("KERNEL_OK")
</pallas_src>

<mosaic_0001>
module attributes {stable_mosaic.version = 11 : i64} {
  func.func @_pe_add_kernel(%arg0: i32, %arg1: memref<8x2x32xf32, #tpu.memory_space<vmem>>, %arg2: memref<8x1x32xf32, #tpu.memory_space<vmem>>, %arg3: memref<8x2x32xf32, #tpu.memory_space<vmem>>) attributes {dimension_semantics = [#tpu.dimension_semantics<parallel>], iteration_bounds = array<i64: 1>, scalar_prefetch = 0 : i64, scratch_operands = 0 : i64, tpu.core_type = #tpu.core_type<tc>, window_params = [{transform_indices = @transform_0, window_bounds = array<i64: 8, 2, 32>}, {transform_indices = @transform_1, window_bounds = array<i64: 8, 1, 32>}, {transform_indices = @transform_2, window_bounds = array<i64: 8, 2, 32>}]} {
    %c0 = arith.constant 0 : index
    %c0_0 = arith.constant 0 : index
    %c0_1 = arith.constant 0 : index
    %0 = vector.load %arg1[%c0, %c0_0, %c0_1] : memref<8x2x32xf32, #tpu.memory_space<vmem>>, vector<8x2x32xf32>
    %c0_2 = arith.constant 0 : index
    %c0_3 = arith.constant 0 : index
    %c0_4 = arith.constant 0 : index
    %1 = vector.load %arg2[%c0_2, %c0_3, %c0_4] : memref<8x1x32xf32, #tpu.memory_space<vmem>>, vector<8x1x32xf32>
    %2 = vector.broadcast %1 : vector<8x1x32xf32> to vector<8x2x32xf32>
    %3 = arith.addf %0, %2 : vector<8x2x32xf32>
    %c0_5 = arith.constant 0 : index
    %c0_6 = arith.constant 0 : index
    %c0_7 = arith.constant 0 : index
    %4 = vector.load %arg3[%c0_5, %c0_6, %c0_7] : memref<8x2x32xf32, #tpu.memory_space<vmem>>, vector<8x2x32xf32>
    tpu.vector_store %arg3[%c0_5, %c0_6, %c0_7], %3 {strides = array<i32>} : memref<8x2x32xf32, #tpu.memory_space<vmem>>, vector<8x2x32xf32>,
    return
  }
  func.func @transform_0(%arg0: i32) -> (i32, i32, i32) {
    %c0_i32 = arith.constant 0 : i32
    %c0_i32_0 = arith.constant 0 : i32
    %c0_i32_1 = arith.constant 0 : i32
    return %arg0, %c0_i32, %c0_i32_0 : i32, i32, i32
  }
  func.func @transform_1(%arg0: i32) -> (i32, i32, i32) {
    %c0_i32 = arith.constant 0 : i32
    %c0_i32_0 = arith.constant 0 : i32
    %c0_i32_1 = arith.constant 0 : i32
    return %arg0, %c0_i32, %c0_i32_0 : i32, i32, i32
  }
  func.func @transform_2(%arg0: i32) -> (i32, i32, i32) {
    %c0_i32 = arith.constant 0 : i32
    %c0_i32_0 = arith.constant 0 : i32
    %c0_i32_1 = arith.constant 0 : i32
    return %arg0, %c0_i32, %c0_i32_0 : i32, i32, i32
  }
}

</mosaic_0001>

<bundles_post_ra>
// kernel: tpu_custom_call.1
= control target key start
LH: loop header
LB: loop body
LE: loop exit
PB: predicated region body
PF: predicated region fallthrough
CT: control target
= control target key end

     0   :  { %vm60_vm0 = vcmask 254976   ;;  %s201_s0 = inlined_call_operand.vmem [shape: f32[8,2,32], index: 0, kind: input, shape index: {}]   ;;  %s202_s1 = inlined_call_operand.vmem [shape: f32[100,1,32], index: 1, kind: input, shape index: {}]   ;;  %s203_s2 = inlined_call_operand.hbm [shape: f32[8,2,32], index: 2, kind: output, shape index: {}]  }
   0x1   :  { %v12_v0 = vld [vmem:[%s201_s0] sm:$0x3]  ;;  %v13_v2 = vld [vmem:[%s201_s0 + $0x2] sm:$0x3]  ;;  %v14_v5 = vld [vmem:[%s201_s0 + $0x4] sm:$0x3] }
   0x2   :  { %v90_v1 = vld [vmem:[%s202_s1] ss:$0 sm:$0xff]  ;;  %v91_v4 = vld [vmem:[%s202_s1 + $0x1] ss:$0 sm:$0xff]  ;;  %v92_v6 = vld [vmem:[%s202_s1 + $0x2] ss:$0 sm:$0xff] }
   0x3   :  { %v52_v3 = vadd.f32 %v90_v1, %v12_v0  ;;  %v15_v7 = vld [vmem:[%s201_s0 + $0x6] sm:$0x3]  ;;  %v53_v8 = vadd.f32 %v91_v4, %v13_v2  ;;  %v93_v9 = vld [vmem:[%s202_s1 + $0x3] ss:$0 sm:$0xff]  ;;  %v16_v10 = vld [vmem:[%s201_s0 + $0x8] sm:$0x3]  ;;  %v54_v11 = vadd.f32 %v92_v6, %v14_v5 }
   0x4   :  { %v94_v12 = vld [vmem:[%s202_s1 + $0x4] ss:$0 sm:$0xff]  ;;  %v17_v13 = vld [vmem:[%s201_s0 + $0xa] sm:$0x3]  ;;  %v55_v14 = vadd.f32 %v93_v9, %v15_v7  ;;  %v95_v15 = vld [vmem:[%s202_s1 + $0x5] ss:$0 sm:$0xff] }
   0x5   :  { %61 = vst.msk [vmem:[#allocation2] sm:$0x3] %vm60_vm0, %v52_v3  ;;  %v56_v16 = vadd.f32 %v94_v12, %v16_v10  ;;  %v18_v17 = vld [vmem:[%s201_s0 + $0xc] sm:$0x3]  ;;  %v57_v18 = vadd.f32 %v95_v15, %v17_v13  ;;  %v96_v19 = vld [vmem:[%s202_s1 + $0x6] ss:$0 sm:$0xff] }
   0x6   :  { %62 = vst.msk [vmem:[#allocation2 + $0x2] sm:$0x3] %vm60_vm0, %v53_v8  ;;  %v19_v20 = vld [vmem:[%s201_s0 + $0xe] sm:$0x3]  ;;  %v97_v21 = vld [vmem:[%s202_s1 + $0x7] ss:$0 sm:$0xff]  ;;  %v58_v22 = vadd.f32 %v96_v19, %v18_v17 }
   0x7   :  { %63 = vst.msk [vmem:[#allocation2 + $0x4] sm:$0x3] %vm60_vm0, %v54_v11 }
   0x8   :  { %64 = vst.msk [vmem:[#allocation2 + $0x6] sm:$0x3] %vm60_vm0, %v55_v14 }
   0x9   :  { %65 = vst.msk [vmem:[#allocation2 + $0x8] sm:$0x3] %vm60_vm0, %v56_v16 }
   0xa   :  { %66 = vst.msk [vmem:[#allocation2 + $0xa] sm:$0x3] %vm60_vm0, %v57_v18 }
   0xb   :  { %7 = vsyncpa [#allocation3], 0  ;;  %s124_s13 = smov [#allocation2]   ;;  %s75_s17 = sshll.u32 %s203_s2, 4  ;;  %v59_v23 = vadd.f32 %v97_v21, %v19_v20  ;;  %67 = vst.msk [vmem:[#allocation2 + $0xc] sm:$0x3] %vm60_vm0, %v58_v22  ;;  %s76_s17 = int_to_ptr.hbm [resolvable:$true] %s75_s17 }
   0xc   :  { %s73_s14 = sshll.u32 %s124_s13, 4  ;;  %s125_s0 = smov 32   ;;  %s74_s14 = int_to_ptr.vmem [resolvable:$true] %s73_s14 }
   0xd   :  { %68 = vst.msk [vmem:[#allocation2 + $0xe] sm:$0x3] %vm60_vm0, %v59_v23  ;;  %s126_s18 = smov 2  }
   0xe   :  { %81 = dma.vmem_to_hbm [thread:$0]  %s74_s14, 256, %s76_s17, [#allocation3], %s125_s0, %s125_s0, %s126_s18  }
   0xf   :  { %122 = dma.done.wait [#allocation3], 256  }
  0x10   :  { %123 = vsyncadd [#allocation3], 4294967040 }
  0x11   :  { %86 = vsyncpa [#allocation3], 1 }

</bundles_post_ra>
